<compile_context>
chip_gen: v7x
topology: tpu7x:2x2x1
jax: 0.10.0
libtpu: 0.0.40
codegen_flags: <defaults>
</compile_context>

<pallas_src>
import functools

import jax
import jax.numpy as jnp
from jax.experimental import pallas as pl
from jax.experimental.pallas import tpu as pltpu


FP = 128  # lane-dense padded feature width for all GCN layers


# ----------------------------- Pallas kernel ----------------------------------

def graph_multi_head_kernel(anorm_ref, x_ref, wg_ref, bg_ref,
                            member_ref, membert_ref,
                            w1max_ref, w1mean_ref, b1_ref,
                            w2_ref, b2_ref, wf_ref, bf_ref,
                            pred_ref, fusion_ref,
                            *, num_layers, num_graphs):
    """Fused GraphMultiHead forward: 3x(GCNConv+ReLU) -> max_mean pool -> MLP head."""
    h = x_ref[...]                       # (N, FP)  lane-dense padded node features
    anorm = anorm_ref[...]               # (N, N)   normalized adjacency

    # --- stacked GCNConv + ReLU layers (weights zero-padded to FP; pad cols stay 0) ---
    for l in range(num_layers):
        xw = jnp.dot(h, wg_ref[l], preferred_element_type=jnp.float32)          # (N, FP)
        h = jnp.maximum(
            jnp.dot(anorm, xw, preferred_element_type=jnp.float32) + bg_ref[l], 0.0)

    # --- global_mean_pool: (member @ x) * 1/count  (count guarded >= 1, EUP recip) ---
    member = member_ref[...]                                        # (G, N)
    counts = jnp.sum(member, axis=1, keepdims=True)                 # (G, 1)
    inv_counts = pl.reciprocal(jnp.maximum(counts, 1.0), approx=True)
    mean_pool = jnp.dot(member, h, preferred_element_type=jnp.float32) * inv_counts

    # --- global_max_pool: per-graph 2D masked reduce (no 3D -inf broadcast) ---
    membert = membert_ref[...]                                      # (N, G)
    rows = []
    for g in range(num_graphs):
        add_mask = (membert[:, g:g + 1] - 1.0) * 1e30               # 0 if member else -1e30
        rows.append(jnp.max(h + add_mask, axis=0, keepdims=True))   # (1, FP)
    max_pool = jnp.concatenate(rows, axis=0)                        # (G, FP)

    # pooled = concat([max, mean], dim=1); the concat is folded into the first linear
    h1 = (jnp.dot(max_pool, w1max_ref[...], preferred_element_type=jnp.float32)
          + jnp.dot(mean_pool, w1mean_ref[...], preferred_element_type=jnp.float32)
          + b1_ref[...])
    h1 = jnp.maximum(h1, 0.0)                                       # relu (dropout p=0)

    feat = jnp.dot(h1, w2_ref[...], preferred_element_type=jnp.float32) + b2_ref[...]

    # Drug.forward tail: relu -> dropout(identity) -> fc
    a = jnp.maximum(feat, 0.0)
    pred_ref[...] = jnp.dot(a, wf_ref[...], preferred_element_type=jnp.float32) + bf_ref[...]

    # GraphMultiHead.forward: fusion = feat / ||feat||_2  (eps-guarded, rsqrt on EUP)
    norm_sq = jnp.sum(feat * feat, axis=1, keepdims=True)
    fusion_ref[...] = feat * jax.lax.rsqrt(jnp.maximum(norm_sq, 1e-24))


# ------------------------------ JAX wrapper ------------------------------------

def _vmem_spec():
    return pl.BlockSpec(memory_space=pltpu.MemorySpace.VMEM)


def _pad2(a, rows, cols):
    return jnp.pad(a, ((0, rows - a.shape[0]), (0, cols - a.shape[1])))


def graph_multi_head_forward(params, x, anorm, member):
    """Full GraphMultiHead.forward (single fused kernel). Returns (pred_y, fusion)."""
    n = x.shape[0]
    g = member.shape[0]
    num_layers = len(params['gnn'])
    feat_dim = params['gnn'][-1][0].shape[1]          # final GNN width (=128 here)
    out_feat = params['w2'].shape[1]
    num_labels = params['wf'].shape[1]

    # Lane-dense layout plumbing (done once, outside the kernel):
    x_p = _pad2(x, n, FP)                                                   # (N, FP)
    wg = jnp.stack([_pad2(w, FP, FP) for (w, _) in params['gnn']])          # (L, FP, FP)
    bg = jnp.stack([_pad2(b, 1, FP) for (_, b) in params['gnn']])           # (L, 1, FP)
    membert = member.T                                                      # (N, G)
    w1_max = _pad2(params['w1'][:feat_dim, :], FP, params['w1'].shape[1])   # (FP, 128)
    w1_mean = _pad2(params['w1'][feat_dim:, :], FP, params['w1'].shape[1])  # (FP, 128)

    kern = functools.partial(graph_multi_head_kernel,
                             num_layers=num_layers, num_graphs=g)
    return pl.pallas_call(
        kern,
        out_shape=(jax.ShapeDtypeStruct((g, num_labels), jnp.float32),
                   jax.ShapeDtypeStruct((g, out_feat), jnp.float32)),
        in_specs=[_vmem_spec() for _ in range(13)],
        out_specs=(_vmem_spec(), _vmem_spec()),
    )(anorm, x_p, wg, bg, member, membert,
      w1_max, w1_mean, params['b1'],
      params['w2'], params['b2'], params['wf'], params['bf'])


# ------------------------------ setup / demo -----------------------------------

def make_params(key):
    dims = [(32, 32), (32, 64), (64, 128)]   # gnn_layers intput/output
    keys = jax.random.split(key, 16)
    ki = iter(range(16))
    gnn = []
    for (fi, fo) in dims:
        w = 0.1 * jax.random.normal(keys[next(ki)], (fi, fo), jnp.float32)
        b = 0.1 * jax.random.normal(keys[next(ki)], (1, fo), jnp.float32)
        gnn.append((w, b))
    params = {'gnn': gnn}
    params['w1'] = 0.1 * jax.random.normal(keys[next(ki)], (256, 128), jnp.float32)
    params['b1'] = 0.1 * jax.random.normal(keys[next(ki)], (1, 128), jnp.float32)
    params['w2'] = 0.1 * jax.random.normal(keys[next(ki)], (128, 128), jnp.float32)
    params['b2'] = 0.1 * jax.random.normal(keys[next(ki)], (1, 128), jnp.float32)
    params['wf'] = 0.1 * jax.random.normal(keys[next(ki)], (128, 1), jnp.float32)
    params['bf'] = 0.1 * jax.random.normal(keys[next(ki)], (1, 1), jnp.float32)
    return params


def make_graph_inputs(key, n_nodes=32, n_graphs=2, feat_dim=32):
    kx, ka = jax.random.split(key)
    x = jax.random.normal(kx, (n_nodes, feat_dim), jnp.float32)

    # batch vector: first half of nodes -> graph 0, second half -> graph 1
    nodes_per_graph = n_nodes // n_graphs
    batch = jnp.repeat(jnp.arange(n_graphs), nodes_per_graph)
    member = (batch[None, :] == jnp.arange(n_graphs)[:, None]).astype(jnp.float32)

    # deterministic random undirected edges, restricted to within-graph pairs
    logits = jax.random.uniform(ka, (n_nodes, n_nodes))
    adj = (logits > 0.7).astype(jnp.float32)
    adj = jnp.maximum(adj, adj.T)                       # symmetric
    same_graph = member.T @ member                      # (N, N) block-diagonal mask
    adj = adj * same_graph
    adj = adj * (1.0 - jnp.eye(n_nodes))                # no explicit self loops in A

    # GCN normalization with added self loops: D^-1/2 (A + I) D^-1/2
    a_hat = adj + jnp.eye(n_nodes, dtype=jnp.float32)
    deg = jnp.sum(a_hat, axis=1)
    dinv = 1.0 / jnp.sqrt(deg)
    anorm = dinv[:, None] * a_hat * dinv[None, :]
    return x, anorm, member


if __name__ == "__main__":
    key = jax.random.PRNGKey(0)
    kp, kd = jax.random.split(key)
    params = make_params(kp)
    x, anorm, member = make_graph_inputs(kd, n_nodes=32, n_graphs=2, feat_dim=32)

    pred_y, fusion = jax.jit(graph_multi_head_forward)(params, x, anorm, member)
    jax.block_until_ready((pred_y, fusion))

    assert pred_y.shape == (2, 1)
    assert fusion.shape == (2, 128)
    # fusion rows are unit-normalized (tolerance allows fast-rsqrt path)
    assert bool(jnp.all(jnp.abs(jnp.sum(fusion * fusion, axis=1) - 1.0) < 1e-3))
    print("KERNEL_OK")
</pallas_src>

<mosaic_0001>
module attributes {stable_mosaic.version = 11 : i64} {
  func.func @graph_multi_head_kernel(%arg0: memref<32x32xf32, #tpu.memory_space<vmem>>, %arg1: memref<32x128xf32, #tpu.memory_space<vmem>>, %arg2: memref<3x128x128xf32, #tpu.memory_space<vmem>>, %arg3: memref<3x1x128xf32, #tpu.memory_space<vmem>>, %arg4: memref<2x32xf32, #tpu.memory_space<vmem>>, %arg5: memref<32x2xf32, #tpu.memory_space<vmem>>, %arg6: memref<128x128xf32, #tpu.memory_space<vmem>>, %arg7: memref<128x128xf32, #tpu.memory_space<vmem>>, %arg8: memref<1x128xf32, #tpu.memory_space<vmem>>, %arg9: memref<128x128xf32, #tpu.memory_space<vmem>>, %arg10: memref<1x128xf32, #tpu.memory_space<vmem>>, %arg11: memref<128x1xf32, #tpu.memory_space<vmem>>, %arg12: memref<1x1xf32, #tpu.memory_space<vmem>>, %arg13: memref<2x1xf32, #tpu.memory_space<vmem>>, %arg14: memref<2x128xf32, #tpu.memory_space<vmem>>) attributes {dimension_semantics = [], scalar_prefetch = 0 : i64, scratch_operands = 0 : i64, tpu.core_type = #tpu.core_type<tc>} {
    %c0 = arith.constant 0 : index
    %c0_0 = arith.constant 0 : index
    %0 = vector.load %arg1[%c0, %c0_0] : memref<32x128xf32, #tpu.memory_space<vmem>>, vector<32x128xf32>
    %c0_1 = arith.constant 0 : index
    %c0_2 = arith.constant 0 : index
    %1 = vector.load %arg0[%c0_1, %c0_2] : memref<32x32xf32, #tpu.memory_space<vmem>>, vector<32x32xf32>
    %c0_3 = arith.constant 0 : index
    %c0_4 = arith.constant 0 : index
    %c0_5 = arith.constant 0 : index
    %2 = vector.load %arg2[%c0_3, %c0_4, %c0_5] : memref<3x128x128xf32, #tpu.memory_space<vmem>>, vector<1x128x128xf32>
    %3 = vector.shape_cast %2 : vector<1x128x128xf32> to vector<128x128xf32>
    %cst = arith.constant dense<0.000000e+00> : vector<32x128xf32>
    %4 = tpu.matmul %0, %3, %cst {dimension_numbers = #tpu.dot_dimension_numbers<[1], [0], [0], [1], [0, 0, 1, 1], [], []>} : vector<32x128xf32>, vector<128x128xf32>, vector<32x128xf32> -> vector<32x128xf32>
    %cst_6 = arith.constant dense<0.000000e+00> : vector<32x128xf32>
    %5 = tpu.matmul %1, %4, %cst_6 {dimension_numbers = #tpu.dot_dimension_numbers<[1], [0], [0], [1], [0, 0, 1, 1], [], []>} : vector<32x32xf32>, vector<32x128xf32>, vector<32x128xf32> -> vector<32x128xf32>
    %c0_7 = arith.constant 0 : index
    %c0_8 = arith.constant 0 : index
    %c0_9 = arith.constant 0 : index
    %6 = vector.load %arg3[%c0_7, %c0_8, %c0_9] : memref<3x1x128xf32, #tpu.memory_space<vmem>>, vector<1x1x128xf32>
    %7 = vector.shape_cast %6 : vector<1x1x128xf32> to vector<1x128xf32>
    %8 = vector.broadcast %7 : vector<1x128xf32> to vector<32x128xf32>
    %9 = arith.addf %5, %8 : vector<32x128xf32>
    %cst_10 = arith.constant 0.000000e+00 : f32
    %10 = vector.broadcast %cst_10 : f32 to vector<32x128xf32>
    %11 = arith.maximumf %9, %10 : vector<32x128xf32>
    %c1 = arith.constant 1 : index
    %c0_11 = arith.constant 0 : index
    %c0_12 = arith.constant 0 : index
    %12 = vector.load %arg2[%c1, %c0_11, %c0_12] : memref<3x128x128xf32, #tpu.memory_space<vmem>>, vector<1x128x128xf32>
    %13 = vector.shape_cast %12 : vector<1x128x128xf32> to vector<128x128xf32>
    %cst_13 = arith.constant dense<0.000000e+00> : vector<32x128xf32>
    %14 = tpu.matmul %11, %13, %cst_13 {dimension_numbers = #tpu.dot_dimension_numbers<[1], [0], [0], [1], [0, 0, 1, 1], [], []>} : vector<32x128xf32>, vector<128x128xf32>, vector<32x128xf32> -> vector<32x128xf32>
    %cst_14 = arith.constant dense<0.000000e+00> : vector<32x128xf32>
    %15 = tpu.matmul %1, %14, %cst_14 {dimension_numbers = #tpu.dot_dimension_numbers<[1], [0], [0], [1], [0, 0, 1, 1], [], []>} : vector<32x32xf32>, vector<32x128xf32>, vector<32x128xf32> -> vector<32x128xf32>
    %c1_15 = arith.constant 1 : index
    %c0_16 = arith.constant 0 : index
    %c0_17 = arith.constant 0 : index
    %16 = vector.load %arg3[%c1_15, %c0_16, %c0_17] : memref<3x1x128xf32, #tpu.memory_space<vmem>>, vector<1x1x128xf32>
    %17 = vector.shape_cast %16 : vector<1x1x128xf32> to vector<1x128xf32>
    %18 = vector.broadcast %17 : vector<1x128xf32> to vector<32x128xf32>
    %19 = arith.addf %15, %18 : vector<32x128xf32>
    %cst_18 = arith.constant 0.000000e+00 : f32
    %20 = vector.broadcast %cst_18 : f32 to vector<32x128xf32>
    %21 = arith.maximumf %19, %20 : vector<32x128xf32>
    %c2 = arith.constant 2 : index
    %c0_19 = arith.constant 0 : index
    %c0_20 = arith.constant 0 : index
    %22 = vector.load %arg2[%c2, %c0_19, %c0_20] : memref<3x128x128xf32, #tpu.memory_space<vmem>>, vector<1x128x128xf32>
    %23 = vector.shape_cast %22 : vector<1x128x128xf32> to vector<128x128xf32>
    %cst_21 = arith.constant dense<0.000000e+00> : vector<32x128xf32>
    %24 = tpu.matmul %21, %23, %cst_21 {dimension_numbers = #tpu.dot_dimension_numbers<[1], [0], [0], [1], [0, 0, 1, 1], [], []>} : vector<32x128xf32>, vector<128x128xf32>, vector<32x128xf32> -> vector<32x128xf32>
    %cst_22 = arith.constant dense<0.000000e+00> : vector<32x128xf32>
    %25 = tpu.matmul %1, %24, %cst_22 {dimension_numbers = #tpu.dot_dimension_numbers<[1], [0], [0], [1], [0, 0, 1, 1], [], []>} : vector<32x32xf32>, vector<32x128xf32>, vector<32x128xf32> -> vector<32x128xf32>
    %c2_23 = arith.constant 2 : index
    %c0_24 = arith.constant 0 : index
    %c0_25 = arith.constant 0 : index
    %26 = vector.load %arg3[%c2_23, %c0_24, %c0_25] : memref<3x1x128xf32, #tpu.memory_space<vmem>>, vector<1x1x128xf32>
    %27 = vector.shape_cast %26 : vector<1x1x128xf32> to vector<1x128xf32>
    %28 = vector.broadcast %27 : vector<1x128xf32> to vector<32x128xf32>
    %29 = arith.addf %25, %28 : vector<32x128xf32>
    %cst_26 = arith.constant 0.000000e+00 : f32
    %30 = vector.broadcast %cst_26 : f32 to vector<32x128xf32>
    %31 = arith.maximumf %29, %30 : vector<32x128xf32>
    %c0_27 = arith.constant 0 : index
    %c0_28 = arith.constant 0 : index
    %32 = vector.load %arg4[%c0_27, %c0_28] : memref<2x32xf32, #tpu.memory_space<vmem>>, vector<2x32xf32>
    %cst_29 = arith.constant dense<0.000000e+00> : vector<2xf32>
    %33 = vector.multi_reduction <add>, %32, %cst_29 [1] : vector<2x32xf32> to vector<2xf32>
    %34 = vector.shape_cast %33 : vector<2xf32> to vector<2x1xf32>
    %cst_30 = arith.constant 1.000000e+00 : f32
    %35 = vector.broadcast %cst_30 : f32 to vector<2x1xf32>
    %36 = arith.maximumf %34, %35 : vector<2x1xf32>
    %37 = tpu.reciprocal %36 {approx = true} : vector<2x1xf32> -> vector<2x1xf32>
    %cst_31 = arith.constant dense<0.000000e+00> : vector<2x128xf32>
    %38 = tpu.matmul %32, %31, %cst_31 {dimension_numbers = #tpu.dot_dimension_numbers<[1], [0], [0], [1], [0, 0, 1, 1], [], []>} : vector<2x32xf32>, vector<32x128xf32>, vector<2x128xf32> -> vector<2x128xf32>
    %39 = vector.broadcast %37 : vector<2x1xf32> to vector<2x128xf32>
    %40 = arith.mulf %38, %39 : vector<2x128xf32>
    %c0_32 = arith.constant 0 : index
    %c0_33 = arith.constant 0 : index
    %41 = vector.load %arg5[%c0_32, %c0_33] : memref<32x2xf32, #tpu.memory_space<vmem>>, vector<32x2xf32>
    %42 = vector.extract_strided_slice %41 {offsets = [0, 0], sizes = [32, 1], strides = [1, 1]} : vector<32x2xf32> to vector<32x1xf32>
    %cst_34 = arith.constant 1.000000e+00 : f32
    %43 = vector.broadcast %cst_34 : f32 to vector<32x1xf32>
    %44 = arith.subf %42, %43 : vector<32x1xf32>
    %cst_35 = arith.constant 1.000000e+30 : f32
    %45 = vector.broadcast %cst_35 : f32 to vector<32x1xf32>
    %46 = arith.mulf %44, %45 : vector<32x1xf32>
    %47 = vector.broadcast %46 : vector<32x1xf32> to vector<32x128xf32>
    %48 = arith.addf %31, %47 : vector<32x128xf32>
    %cst_36 = arith.constant dense<0xFF800000> : vector<128xf32>
    %49 = vector.multi_reduction <maximumf>, %48, %cst_36 [0] : vector<32x128xf32> to vector<128xf32>
    %50 = vector.shape_cast %49 : vector<128xf32> to vector<1x128xf32>
    %51 = vector.extract_strided_slice %41 {offsets = [0, 1], sizes = [32, 1], strides = [1, 1]} : vector<32x2xf32> to vector<32x1xf32>
    %cst_37 = arith.constant 1.000000e+00 : f32
    %52 = vector.broadcast %cst_37 : f32 to vector<32x1xf32>
    %53 = arith.subf %51, %52 : vector<32x1xf32>
    %cst_38 = arith.constant 1.000000e+30 : f32
    %54 = vector.broadcast %cst_38 : f32 to vector<32x1xf32>
    %55 = arith.mulf %53, %54 : vector<32x1xf32>
    %56 = vector.broadcast %55 : vector<32x1xf32> to vector<32x128xf32>
    %57 = arith.addf %31, %56 : vector<32x128xf32>
    %cst_39 = arith.constant dense<0xFF800000> : vector<128xf32>
    %58 = vector.multi_reduction <maximumf>, %57, %cst_39 [0] : vector<32x128xf32> to vector<128xf32>
    %59 = vector.shape_cast %58 : vector<128xf32> to vector<1x128xf32>
    %60 = tpu.concatenate %50, %59 in 0 : vector<1x128xf32>, vector<1x128xf32> -> vector<2x128xf32>
    %c0_40 = arith.constant 0 : index
    %c0_41 = arith.constant 0 : index
    %61 = vector.load %arg6[%c0_40, %c0_41] : memref<128x128xf32, #tpu.memory_space<vmem>>, vector<128x128xf32>
    %cst_42 = arith.constant dense<0.000000e+00> : vector<2x128xf32>
    %62 = tpu.matmul %60, %61, %cst_42 {dimension_numbers = #tpu.dot_dimension_numbers<[1], [0], [0], [1], [0, 0, 1, 1], [], []>} : vector<2x128xf32>, vector<128x128xf32>, vector<2x128xf32> -> vector<2x128xf32>
    %c0_43 = arith.constant 0 : index
    %c0_44 = arith.constant 0 : index
    %63 = vector.load %arg7[%c0_43, %c0_44] : memref<128x128xf32, #tpu.memory_space<vmem>>, vector<128x128xf32>
    %cst_45 = arith.constant dense<0.000000e+00> : vector<2x128xf32>
    %64 = tpu.matmul %40, %63, %cst_45 {dimension_numbers = #tpu.dot_dimension_numbers<[1], [0], [0], [1], [0, 0, 1, 1], [], []>} : vector<2x128xf32>, vector<128x128xf32>, vector<2x128xf32> -> vector<2x128xf32>
    %65 = arith.addf %62, %64 : vector<2x128xf32>
    %c0_46 = arith.constant 0 : index
    %c0_47 = arith.constant 0 : index
    %66 = vector.load %arg8[%c0_46, %c0_47] : memref<1x128xf32, #tpu.memory_space<vmem>>, vector<1x128xf32>
    %67 = vector.broadcast %66 : vector<1x128xf32> to vector<2x128xf32>
    %68 = arith.addf %65, %67 : vector<2x128xf32>
    %cst_48 = arith.constant 0.000000e+00 : f32
    %69 = vector.broadcast %cst_48 : f32 to vector<2x128xf32>
    %70 = arith.maximumf %68, %69 : vector<2x128xf32>
    %c0_49 = arith.constant 0 : index
    %c0_50 = arith.constant 0 : index
    %71 = vector.load %arg9[%c0_49, %c0_50] : memref<128x128xf32, #tpu.memory_space<vmem>>, vector<128x128xf32>
    %cst_51 = arith.constant dense<0.000000e+00> : vector<2x128xf32>
    %72 = tpu.matmul %70, %71, %cst_51 {dimension_numbers = #tpu.dot_dimension_numbers<[1], [0], [0], [1], [0, 0, 1, 1], [], []>} : vector<2x128xf32>, vector<128x128xf32>, vector<2x128xf32> -> vector<2x128xf32>
    %c0_52 = arith.constant 0 : index
    %c0_53 = arith.constant 0 : index
    %73 = vector.load %arg10[%c0_52, %c0_53] : memref<1x128xf32, #tpu.memory_space<vmem>>, vector<1x128xf32>
    %74 = vector.broadcast %73 : vector<1x128xf32> to vector<2x128xf32>
    %75 = arith.addf %72, %74 : vector<2x128xf32>
    %cst_54 = arith.constant 0.000000e+00 : f32
    %76 = vector.broadcast %cst_54 : f32 to vector<2x128xf32>
    %77 = arith.maximumf %75, %76 : vector<2x128xf32>
    %c0_55 = arith.constant 0 : index
    %c0_56 = arith.constant 0 : index
    %78 = vector.load %arg11[%c0_55, %c0_56] : memref<128x1xf32, #tpu.memory_space<vmem>>, vector<128x1xf32>
    %cst_57 = arith.constant dense<0.000000e+00> : vector<2x1xf32>
    %79 = tpu.matmul %77, %78, %cst_57 {dimension_numbers = #tpu.dot_dimension_numbers<[1], [0], [0], [1], [0, 0, 1, 1], [], []>} : vector<2x128xf32>, vector<128x1xf32>, vector<2x1xf32> -> vector<2x1xf32>
    %c0_58 = arith.constant 0 : index
    %c0_59 = arith.constant 0 : index
    %80 = vector.load %arg12[%c0_58, %c0_59] : memref<1x1xf32, #tpu.memory_space<vmem>>, vector<1x1xf32>
    %81 = vector.broadcast %80 : vector<1x1xf32> to vector<2x1xf32>
    %82 = arith.addf %79, %81 : vector<2x1xf32>
    %c0_60 = arith.constant 0 : index
    %c0_61 = arith.constant 0 : index
    %83 = vector.load %arg13[%c0_60, %c0_61] : memref<2x1xf32, #tpu.memory_space<vmem>>, vector<2x1xf32>
    tpu.vector_store %arg13[%c0_60, %c0_61], %82 {strides = array<i32>} : memref<2x1xf32, #tpu.memory_space<vmem>>, vector<2x1xf32>,
    %84 = arith.mulf %75, %75 : vector<2x128xf32>
    %cst_62 = arith.constant dense<0.000000e+00> : vector<2xf32>
    %85 = vector.multi_reduction <add>, %84, %cst_62 [1] : vector<2x128xf32> to vector<2xf32>
    %86 = vector.shape_cast %85 : vector<2xf32> to vector<2x1xf32>
    %cst_63 = arith.constant 1.000000e-24 : f32
    %87 = vector.broadcast %cst_63 : f32 to vector<2x1xf32>
    %88 = arith.maximumf %86, %87 : vector<2x1xf32>
    %89 = math.rsqrt %88 : vector<2x1xf32>
    %90 = vector.broadcast %89 : vector<2x1xf32> to vector<2x128xf32>
    %91 = arith.mulf %75, %90 : vector<2x128xf32>
    %c0_64 = arith.constant 0 : index
    %c0_65 = arith.constant 0 : index
    %92 = vector.load %arg14[%c0_64, %c0_65] : memref<2x128xf32, #tpu.memory_space<vmem>>, vector<2x128xf32>
    tpu.vector_store %arg14[%c0_64, %c0_65], %91 {strides = array<i32>} : memref<2x128xf32, #tpu.memory_space<vmem>>, vector<2x128xf32>,
    return
  }
}

</mosaic_0001>

<bundles_post_ra>
// kernel: graph_multi_head_forward.1
= control target key start
LH: loop header
LB: loop body
LE: loop exit
PB: predicated region body
PF: predicated region fallthrough
CT: control target
= control target key end

     0   :  { %s2573_s0 = inlined_call_operand.vmem [shape: f32[32,32], index: 0, kind: input, shape index: {}]   ;;  %s2574_s1 = inlined_call_operand.vmem [shape: f32[32,128], index: 1, kind: input, shape index: {}]   ;;  %s2575_s2 = inlined_call_operand.vmem [shape: f32[3,128,128], index: 2, kind: input, shape index: {}]   ;;  %s2576_s3 = inlined_call_operand.vmem [shape: f32[3,1,128], index: 3, kind: input, shape index: {}]   ;;  %s2577_s4 = inlined_call_operand.vmem [shape: f32[2,32], index: 4, kind: input, shape index: {}]   ;;  %s2578_s5 = inlined_call_operand.vmem [shape: f32[32,2], index: 5, kind: input, shape index: {}]   ;;  %s2579_s6 = inlined_call_operand.vmem [shape: f32[128,128], index: 6, kind: input, shape index: {}]   ;;  %s2580_s7 = inlined_call_operand.vmem [shape: f32[128,128], index: 7, kind: input, shape index: {}]   ;;  %s2581_s8 = inlined_call_operand.vmem [shape: f32[1,128], index: 8, kind: input, shape index: {}]   ;;  %s2582_s9 = inlined_call_operand.vmem [shape: f32[128,128], index: 9, kind: input, shape index: {}]   ;;  %s2583_s10 = inlined_call_operand.vmem [shape: f32[1,128], index: 10, kind: input, shape index: {}]   ;;  %s2584_s11 = inlined_call_operand.vmem [shape: f32[128,1], index: 11, kind: input, shape index: {}]   ;;  %s2585_s12 = inlined_call_operand.<no memory space> [shape: f32[1,1], index: 12, kind: input, shape index: {}]   ;;  %s2586_s13 = inlined_call_operand.vmem [shape: f32[2,1], index: 13, kind: output, shape index: {0}]   ;;  %s2587_s14 = inlined_call_operand.hbm [shape: f32[2,128], index: 14, kind: output, shape index: {1}]  }
   0x1   :  { %v20_v0 = vstv %s2585_s12 }
   0x2   :  { %21 = vst [vmem:[#allocation2] sm:$0x1] %v20_v0 }
   0x3   :  { %v57_v1 = vld [vmem:[%s2575_s2] sm:$0xff]  ;;  %v58_v2 = vld [vmem:[%s2575_s2 + $0x8] sm:$0xff]  ;;  %v59_v3 = vld [vmem:[%s2575_s2 + $0x10] sm:$0xff] }
   0x4   :  { %v1740_v4 = vpack.c.bf16 %v58_v2, %v57_v1  ;;  %v60_v5 = vld [vmem:[%s2575_s2 + $0x18] sm:$0xff]  ;;  %v61_v7 = vld [vmem:[%s2575_s2 + $0x20] sm:$0xff]  ;;  %v62_v8 = vld [vmem:[%s2575_s2 + $0x28] sm:$0xff] }
   0x5   :  { %v1744_v6 = vpack.c.bf16 %v60_v5, %v59_v3  ;;  %v1748_v9 = vpack.c.bf16 %v62_v8, %v61_v7  ;;  %v49_v10 = vld [vmem:[%s2574_s1] sm:$0xff]  ;;  %v63_v11 = vld [vmem:[%s2575_s2 + $0x30] sm:$0xff]  ;;  %v64_v12 = vld [vmem:[%s2575_s2 + $0x38] sm:$0xff] }
   0x6   :  { %1741 = vmatprep.subr.bf16.mxu0 %v1740_v4  ;;  %1465 = vmatprep.mubr.f32.mxu0 %v49_v10 }
   0x7   :  { %1743 = vmatpush3.bf16.msra.mxu0 %v1740_v4 }
   0x8   :  { %1745 = vmatprep.subr.bf16.mxu0 %v1744_v6 }
   0x9   :  { %22 = vsyncpa [#allocation4], 0  ;;  %v1752_v13 = vpack.c.bf16 %v64_v12, %v63_v11  ;;  %v65_v14 = vld [vmem:[%s2575_s2 + $0x40] sm:$0xff]  ;;  %v66_v15 = vld [vmem:[%s2575_s2 + $0x48] sm:$0xff]  ;;  %vm165_vm0 = vcmask 261120   ;;  %vm666_vm1 = vcmask 254976  }
   0xa   :  { %v1756_v16 = vpack.c.bf16 %v66_v15, %v65_v14  ;;  %v67_v17 = vld [vmem:[%s2575_s2 + $0x50] sm:$0xff]  ;;  %v68_v18 = vld [vmem:[%s2575_s2 + $0x58] sm:$0xff]  ;;  %v69_v20 = vld [vmem:[%s2575_s2 + $0x60] sm:$0xff]  ;;  %vm2003_vm2 = vmmov 0   ;;  %vm820_vm3 = vcmask 1040384   ;;  %vm1193_vm4 = vcmask 1041408  }
   0xb   :  { %1747 = vmatpush3.bf16.msra.mxu0 %v1744_v6  ;;  %v1760_v19 = vpack.c.bf16 %v68_v18, %v67_v17  ;;  %v70_v21 = vld [vmem:[%s2575_s2 + $0x68] sm:$0xff]  ;;  %v71_v23 = vld [vmem:[%s2575_s2 + $0x70] sm:$0xff]  ;;  %v72_v24 = vld [vmem:[%s2575_s2 + $0x78] sm:$0xff] }
   0xc   :  { %1749 = vmatprep.subr.bf16.mxu0 %v1748_v9  ;;  %v1764_v22 = vpack.c.bf16 %v70_v21, %v69_v20  ;;  %v1768_v25 = vpack.c.bf16 %v72_v24, %v71_v23  ;;  %v50_v26 = vld [vmem:[%s2574_s1 + $0x8] sm:$0xff]  ;;  %v51_v27 = vld [vmem:[%s2574_s1 + $0x10] sm:$0xff]  ;;  %v52_v28 = vld [vmem:[%s2574_s1 + $0x18] sm:$0xff] }
   0xd   :  { %v2147_v29 = vld [vmem:[%s2573_s0] sm:$0xff]  ;;  %v1225_v34 = vld [vmem:[%s2575_s2 + $0x88] sm:$0xff]  ;;  %v1226_v39 = vld [vmem:[%s2575_s2 + $0x90] sm:$0xff] }
   0xe   :  { %1479 = vmatprep.mubr.msk.f32.mxu1 %vm165_vm0, %v2147_v29  ;;  %v1224_v33 = vld [vmem:[%s2575_s2 + $0x80] sm:$0xff]  ;;  %v1227_v40 = vld [vmem:[%s2575_s2 + $0x98] sm:$0xff]  ;;  %v2166_v41 = vld [vmem:[%s2573_s0 + $0x8] sm:$0xff] }
   0xf   :  { %1751 = vmatpush3.bf16.msra.mxu0 %v1748_v9  ;;  %v1780_v38 = vpack.c.bf16 %v1225_v34, %v1224_v33  ;;  %v2171_v42 = vld [vmem:[%s2573_s0 + $0x10] sm:$0xff]  ;;  %v1784_v43 = vpack.c.bf16 %v1227_v40, %v1226_v39  ;;  %v1228_v44 = vld [vmem:[%s2575_s2 + $0xa0] sm:$0xff]  ;;  %v1229_v45 = vld [vmem:[%s2575_s2 + $0xa8] sm:$0xff] }
  0x10   :  { %1753 = vmatprep.subr.bf16.mxu0 %v1752_v13  ;;  %v2186_v46 = vld [vmem:[%s2573_s0 + $0x18] sm:$0xff]  ;;  %v1788_v47 = vpack.c.bf16 %v1229_v45, %v1228_v44  ;;  %v1230_v48 = vld [vmem:[%s2575_s2 + $0xb0] sm:$0xff]  ;;  %v1232_v51 = vld [vmem:[%s2575_s2 + $0xc0] sm:$0xff] }
  0x11   :  { %v1231_v49 = vld [vmem:[%s2575_s2 + $0xb8] sm:$0xff]  ;;  %v1233_v52 = vld [vmem:[%s2575_s2 + $0xc8] sm:$0xff]  ;;  %v1234_v54 = vld [vmem:[%s2575_s2 + $0xd0] sm:$0xff] }
  0x12   :  { %v1792_v50 = vpack.c.bf16 %v1231_v49, %v1230_v48  ;;  %v1796_v53 = vpack.c.bf16 %v1233_v52, %v1232_v51  ;;  %v1235_v55 = vld [vmem:[%s2575_s2 + $0xd8] sm:$0xff]  ;;  %v1236_v57 = vld [vmem:[%s2575_s2 + $0xe0] sm:$0xff]  ;;  %v1237_v58 = vld [vmem:[%s2575_s2 + $0xe8] sm:$0xff] }
  0x13   :  { %1755 = vmatpush3.bf16.msra.mxu0 %v1752_v13  ;;  %v1800_v56 = vpack.c.bf16 %v1235_v55, %v1234_v54  ;;  %v1804_v59 = vpack.c.bf16 %v1237_v58, %v1236_v57  ;;  %v1238_v60 = vld [vmem:[%s2575_s2 + $0xf0] sm:$0xff]  ;;  %v1239_v61 = vld [vmem:[%s2575_s2 + $0xf8] sm:$0xff]  ;;  %v1219_v63 = vld [vmem:[%s2576_s3] ss:$0 sm:$0xff] }
  0x14   :  { %1757 = vmatprep.subr.bf16.mxu0 %v1756_v16  ;;  %v1808_v62 = vpack.c.bf16 %v1239_v61, %v1238_v60  ;;  %v1246_v12 = vld [vmem:[%s2575_s2 + $0x100] sm:$0xff]  ;;  %v1247_v13 = vld [vmem:[%s2575_s2 + $0x108] sm:$0xff]  ;;  %v1248_v14 = vld [vmem:[%s2575_s2 + $0x110] sm:$0xff]  ;;  %v2000_v61 = vmov 0  }
  0x15   :  { %v1820_v15 = vpack.c.bf16 %v1247_v13, %v1246_v12  ;;  %v1250_v18 = vld [vmem:[%s2575_s2 + $0x120] sm:$0xff]  ;;  %v1252_v21 = vld [vmem:[%s2575_s2 + $0x130] sm:$0xff]  ;;  %v747_v58 = vld [vmem:[%s2578_s5 + $0x8] sm:$0xff]  ;;  %1969 = vset.pattern.permute.xlu1 %v2000_v61  ;;  %1968 = vset.pattern.permute.xlu0 %v2000_v61  ;;  %v2002_v12 = vmov 0.0|0.0  }
  0x16   :  { %v1254_v24 = vld [vmem:[%s2575_s2 + $0x140] sm:$0xff]  ;;  %v1260_v40 = vld [vmem:[%s2575_s2 + $0x170] sm:$0xff] }
  0x17   :  { %1759 = vmatpush3.bf16.msra.mxu0 %v1756_v16  ;;  %v1249_v16 = vld [vmem:[%s2575_s2 + $0x118] sm:$0xff]  ;;  %v1241_v45 = vld [vmem:[%s2576_s3 + $0x1] ss:$0 sm:$0xff]  ;;  %v748_v60 = vld [vmem:[%s2578_s5 + $0x10] sm:$0xff] }
  0x18   :  { %1761 = vmatprep.subr.bf16.mxu0 %v1760_v19  ;;  %v1824_v17 = vpack.c.bf16 %v1249_v16, %v1248_v14 }
  0x1b   :  { %1763 = vmatpush3.bf16.msra.mxu0 %v1760_v19  ;;  %v1251_v19 = vld [vmem:[%s2575_s2 + $0x128] sm:$0xff] }
  0x1c   :  { %1765 = vmatprep.subr.bf16.mxu0 %v1764_v22  ;;  %v1828_v20 = vpack.c.bf16 %v1251_v19, %v1250_v18 }
  0x1f   :  { %1767 = vmatpush3.bf16.msra.mxu0 %v1764_v22  ;;  %v1253_v22 = vld [vmem:[%s2575_s2 + $0x138] sm:$0xff] }
  0x20   :  { %1769 = vmatprep.subr.bf16.mxu0 %v1768_v25  ;;  %v1832_v23 = vpack.c.bf16 %v1253_v22, %v1252_v21  ;;  %v825_v21 = vld [vmem:[%s2579_s6 + $0x18] sm:$0xff] }
  0x23   :  { %1771 = vmatpush3.bf16.msra.mxu0 %v1768_v25  ;;  %v1255_v25 = vld [vmem:[%s2575_s2 + $0x148] sm:$0xff] }
  0x24   :  { %1821 = vmatprep.subr.bf16.mxu0 %v1820_v15 }
  0x26   :  { %1466 = vmatmul.mubr.f32.vlgmr.msra.gmra.mrb[0].mxu0 %v50_v26  ;;  %v1836_v26 = vpack.c.bf16 %v1255_v25, %v1254_v24  ;;  %v829_v24 = vld [vmem:[%s2579_s6 + $0x38] sm:$0xff] }
  0x27   :  { %1468 = vmatprep.mubr.f32.mxu0 %v51_v27  ;;  %1823 = vmatpush3.bf16.msra.mxu0 %v1820_v15  ;;  %v1256_v27 = vld [vmem:[%s2575_s2 + $0x150] sm:$0xff] }
  0x28   :  { %1825 = vmatprep.subr.bf16.mxu0 %v1824_v17 }
  0x2a   :  { %1469 = vmatmul.mubr.f32.gmra.mrb[2].mxu0 %v52_v28  ;;  %v1257_v28 = vld [vmem:[%s2575_s2 + $0x158] sm:$0xff] }
  0x2b   :  { %1827 = vmatpush3.bf16.msra.mxu0 %v1824_v17 }
  0x2c   :  { %1829 = vmatprep.subr.bf16.mxu0 %v1828_v20 }
  0x2f   :  { %1831 = vmatpush3.bf16.msra.mxu0 %v1828_v20  ;;  %v824_v20 = vld [vmem:[%s2579_s6 + $0x10] sm:$0xff] }
  0x30   :  { %1833 = vmatprep.subr.bf16.mxu0 %v1832_v23  ;;  %v1894_v22 = vpack.c.bf16 %v825_v21, %v824_v20  ;;  %v841_v20 = vld [vmem:[%s2580_s7 + $0x18] sm:$0xff] }
  0x33   :  { %1835 = vmatpush3.bf16.msra.mxu0 %v1832_v23  ;;  %v828_v23 = vld [vmem:[%s2579_s6 + $0x30] sm:$0xff] }
  0x34   :  { %1837 = vmatprep.subr.bf16.mxu0 %v1836_v26  ;;  %v1900_v25 = vpack.c.bf16 %v829_v24, %v828_v23  ;;  %v842_v23 = vld [vmem:[%s2580_s7 + $0x20] sm:$0xff]  ;;  %v843_v24 = vld [vmem:[%s2580_s7 + $0x28] sm:$0xff] }
  0x37   :  { %1839 = vmatpush3.bf16.msra.mxu0 %v1836_v26  ;;  %v830_v26 = vld [vmem:[%s2579_s6 + $0x40] sm:$0xff] }
  0xf9   :  { %v1467_v30 = vpop.f32.mrb[0].mxu0 }
  0xfa   :  { %v139_v31 = vpop.f32.mrb[1].mxu0 }
  0xfb   :  { %v1772_v32 = vpack.c.bf16 %v1467_v30, %v139_v31  ;;  %v1840_v30 = vpack.c.bf16 %v1257_v28, %v1256_v27  ;;  %v1258_v31 = vld [vmem:[%s2575_s2 + $0x160] sm:$0xff]  ;;  %v831_v27 = vld [vmem:[%s2579_s6 + $0x48] sm:$0xff] }
  0xfc   :  { %v1903_v28 = vpack.c.bf16 %v831_v27, %v830_v26 }
  0xfd   :  { %v1470_v35 = vpop.f32.mrb[2].mxu0  ;;  %1773 = vmatprep.subr.bf16.mxu1 %v1772_v32  ;;  %1841 = vmatprep.subr.bf16.mxu0 %v1840_v30 }
  0xfe   :  { %v149_v36 = vpop.f32.mrb[3].mxu0  ;;  %1775 = vmatpush3.bf16.msra.mxu1 %v1772_v32  ;;  %v1259_v32 = vld [vmem:[%s2575_s2 + $0x168] sm:$0xff]  ;;  %1843 = vmatpush3.bf16.msra.mxu0 %v1840_v30  ;;  %v2004_v30 = vmov 0.0  }
  0xff   :  { %v1776_v37 = vpack.c.bf16 %v1470_v35, %v149_v36  ;;  %v1844_v33 = vpack.c.bf16 %v1259_v32, %v1258_v31  ;;  %v832_v31 = vld [vmem:[%s2579_s6 + $0x50] sm:$0xff]  ;;  %v833_v32 = vld [vmem:[%s2579_s6 + $0x58] sm:$0xff] }
 0x101   :  { %1777 = vmatprep.subr.bf16.mxu1 %v1776_v37  ;;  %1845 = vmatprep.subr.bf16.mxu0 %v1844_v33 }
 0x102   :  { %1779 = vmatpush3.bf16.msra.mxu1 %v1776_v37  ;;  %1847 = vmatpush3.bf16.msra.mxu0 %v1844_v33  ;;  %v1906_v33 = vpack.c.bf16 %v833_v32, %v832_v31  ;;  %v844_v31 = vld [vmem:[%s2580_s7 + $0x30] sm:$0xff]  ;;  %v845_v32 = vld [vmem:[%s2580_s7 + $0x38] sm:$0xff] }
 0x103   :  { %1781 = vmatprep.subr.bf16.mxu1 %v1780_v38 }
 0x105   :  { %1480 = vmatmul.mubr.msk.f32.vlgmr.msra.gmra.mrb[0].mxu1 %vm165_vm0, %v2166_v41 }
 0x106   :  { %1482 = vmatprep.mubr.msk.f32.mxu1 %vm165_vm0, %v2171_v42  ;;  %1783 = vmatpush3.bf16.msra.mxu1 %v1780_v38 }
 0x107   :  { %1785 = vmatprep.subr.bf16.mxu1 %v1784_v43 }
 0x109   :  { %1483 = vmatmul.mubr.msk.f32.gmra.mrb[2].mxu1 %vm165_vm0, %v2186_v46 }
 0x10a   :  { %1787 = vmatpush3.bf16.msra.mxu1 %v1784_v43  ;;  %v1261_v43 = vld [vmem:[%s2575_s2 + $0x178] sm:$0xff] }
 0x10b   :  { %1789 = vmatprep.subr.bf16.mxu1 %v1788_v47  ;;  %v1848_v44 = vpack.c.bf16 %v1261_v43, %v1260_v40 }
 0x10d   :  { %1849 = vmatprep.subr.bf16.mxu0 %v1848_v44 }
 0x10e   :  { %1791 = vmatpush3.bf16.msra.mxu1 %v1788_v47  ;;  %1851 = vmatpush3.bf16.msra.mxu0 %v1848_v44 }
 0x10f   :  { %1793 = vmatprep.subr.bf16.mxu1 %v1792_v50  ;;  %1890 = vmatprep.subr.bf16.mxu0 %v2002_v12 }
 0x112   :  { %1795 = vmatpush3.bf16.msra.mxu1 %v1792_v50 }
 0x113   :  { %1797 = vmatprep.subr.bf16.mxu1 %v1796_v53 }
 0x116   :  { %1799 = vmatpush3.bf16.msra.mxu1 %v1796_v53 }
 0x117   :  { %1801 = vmatprep.subr.bf16.mxu1 %v1800_v56 }
 0x11a   :  { %1803 = vmatpush3.bf16.msra.mxu1 %v1800_v56 }
 0x11b   :  { %1805 = vmatprep.subr.bf16.mxu1 %v1804_v59 }
 0x11e   :  { %1807 = vmatpush3.bf16.msra.mxu1 %v1804_v59  ;;  %v2290_v59 = vld [vmem:[%s2577_s4] sm:$0x3] }
 0x11f   :  { %1809 = vmatprep.subr.bf16.mxu1 %v1808_v62 }
 0x122   :  { %1811 = vmatpush3.bf16.msra.mxu1 %v1808_v62  ;;  %v1270_v62 = vadd.f32 -1.0, %v747_v58 }
 0x1d8   :  { %v1481_v0 = vpop.f32.mrb[0].mxu1 }
 0x1d9   :  { %v250_v1 = vadd.f32 %v1481_v0, %v1219_v63  ;;  %v244_v2 = vpop.f32.mrb[1].mxu1  ;;  %v1271_v0 = vadd.f32 -1.0, %v748_v60 }
 0x1da   :  { %v245_v3 = vadd.f32 %v1219_v63, %v244_v2  ;;  %v755_v2 = vmul.f32 1e+30, %v1270_v62 }
 0x1db   :  { %v264_v6 = vmax.f32 %v250_v1, 0.0  ;;  %v749_v1 = vld [vmem:[%s2578_s5 + $0x18] sm:$0xff] }
 0x1dc   :  { %v263_v4 = vmax.f32 %v245_v3, 0.0  ;;  %v1484_v5 = vpop.f32.mrb[2].mxu1  ;;  %765 = vperm.xlu1 %1969, %v755_v2   ;;  %v756_v3 = vmul.f32 1e+30, %v1271_v0 }
 0x1dd   :  { %v260_v7 = vadd.f32 %v1484_v5, %v1219_v63  ;;  %v254_v8 = vpop.f32.mrb[3].mxu1  ;;  %v746_v5 = vld [vmem:[%s2578_s5] sm:$0xff] }
 0x1de   :  { %v255_v9 = vadd.f32 %v1219_v63, %v254_v8  ;;  %1517 = vmatprep.mubr.f32.mxu1 %v263_v4  ;;  %v667_v63 = vsel %vm666_vm1, %v2290_v59, 0.0  ;;  %v1272_v4 = vadd.f32 -1.0, %v749_v1 }
 0x1df   :  { %1518 = vmatmul.mubr.f32.vlgmr.msra.gmra.mrb[4].mxu1 %v264_v6  ;;  %v266_v11 = vmax.f32 %v260_v7, 0.0  ;;  %668 = vadd.xlane.f32.xlu0 %v667_v63  ;;  %v1269_v7 = vadd.f32 -1.0, %v746_v5 }
 0x1e0   :  { %v265_v10 = vmax.f32 %v255_v9, 0.0  ;;  %770 = vperm.xlu1 %1969, %v756_v3   ;;  %v757_v6 = vmul.f32 1e+30, %v1272_v4  ;;  %v2001_v9 = vmov 1  }
 0x1e1   :  { %v754_v8 = vmul.f32 1e+30, %v1269_v7 }
 0x1e2   :  { %1520 = vmatprep.mubr.f32.mxu1 %v265_v10  ;;  %v822_v10 = vld [vmem:[%s2579_s6] sm:$0xff] }
 0x1e3   :  { %1521 = vmatmul.mubr.f32.gmra.mrb[6].mxu1 %v266_v11  ;;  %v823_v11 = vld [vmem:[%s2579_s6 + $0x8] sm:$0xff] }
 0x1e4   :  { %1531 = vmatprep.mubr.msk.f32.mxu1 %vm165_vm0, %v2147_v29  ;;  %775 = vperm.xlu1 %1969, %v757_v6   ;;  %v1891_v13 = vpack.c.bf16 %v823_v11, %v822_v10  ;;  %v838_v10 = vld [vmem:[%s2580_s7] sm:$0xff]  ;;  %v839_v11 = vld [vmem:[%s2580_s7 + $0x8] sm:$0xff] }
 0x1e8   :  { %1970 = vset.pattern.permute.xlu1 %v2001_v9 }
 0x1e9   :  { %792 = vperm.xlu1 %1970, %v754_v8  }
 0x1ed   :  { %796 = vperm.xlu1 %1970, %v755_v2  }
 0x1f1   :  { %800 = vperm.xlu1 %1970, %v756_v3  }
 0x1f5   :  { %760 = vperm.xlu0 %1968, %v754_v8   ;;  %804 = vperm.xlu1 %1970, %v757_v6  }
 0x1f9   :  { %1971 = vset.pattern.permute.xlu0 %v2001_v9 }
 0x25b   :  { %v766_v40 = vpop.permute.xlu1 %765 }
 0x25f   :  { %v771_v43 = vpop.permute.xlu1 %770 }
 0x263   :  { %v776_v44 = vpop.permute.xlu1 %775 }
 0x2b2   :  { %v1519_v34 = vpop.f32.mrb[4].mxu1 }
 0x2b3   :  { %v350_v35 = vpop.f32.mrb[5].mxu1 }
 0x2b4   :  { %v1812_v36 = vpack.c.bf16 %v1519_v34, %v350_v35  ;;  %v834_v34 = vld [vmem:[%s2579_s6 + $0x60] sm:$0xff]  ;;  %v835_v35 = vld [vmem:[%s2579_s6 + $0x68] sm:$0xff] }
 0x2b6   :  { %v1522_v37 = vpop.f32.mrb[6].mxu1  ;;  %1813 = vmatprep.subr.bf16.mxu1 %v1812_v36 }
 0x2b7   :  { %v360_v38 = vpop.f32.mrb[7].mxu1  ;;  %1815 = vmatpush3.bf16.msra.mxu1 %v1812_v36  ;;  %v1909_v36 = vpack.c.bf16 %v835_v35, %v834_v34 }
 0x2b8   :  { %v1816_v39 = vpack.c.bf16 %v1522_v37, %v360_v38  ;;  %v836_v37 = vld [vmem:[%s2579_s6 + $0x70] sm:$0xff]  ;;  %v837_v38 = vld [vmem:[%s2579_s6 + $0x78] sm:$0xff] }
 0x2ba   :  { %1817 = vmatprep.subr.bf16.mxu1 %v1816_v39 }
 0x2bb   :  { %1819 = vmatpush3.bf16.msra.mxu1 %v1816_v39  ;;  %v1912_v39 = vpack.c.bf16 %v837_v38, %v836_v37  ;;  %v1876_v37 = vpack.c.bf16 %v845_v32, %v844_v31  ;;  %v846_v38 = vld [vmem:[%s2580_s7 + $0x40] sm:$0xff]  ;;  %v1104_v31 = vld [vmem:[%s2584_s11 + $0x38] sm:$0xff] }
 0x2be   :  { %1532 = vmatmul.mubr.msk.f32.vlgmr.msra.gmra.mrb[8].mxu1 %vm165_vm0, %v2166_v41 }
 0x2bf   :  { %1534 = vmatprep.mubr.msk.f32.mxu1 %vm165_vm0, %v2171_v42 }
 0x2c2   :  { %1535 = vmatmul.mubr.msk.f32.gmra.mrb[10].mxu1 %vm165_vm0, %v2186_v46 }
 0x2c3   :  { %1583 = vmatprep.mubr.msk.f32.mxu1 %vm165_vm0, %v2147_v29 }
 0x391   :  { %v1533_v47 = vpop.f32.mrb[8].mxu1 }
 0x392   :  { %v449_v48 = vadd.f32 %v1533_v47, %v1241_v45  ;;  %v443_v49 = vpop.f32.mrb[9].mxu1 }
 0x393   :  { %v444_v50 = vadd.f32 %v1241_v45, %v443_v49  ;;  %v1263_v49 = vld [vmem:[%s2576_s3 + $0x2] ss:$0 sm:$0xff] }
 0x394   :  { %v463_v52 = vmax.f32 %v449_v48, 0.0  ;;  %v2370_v48 = vpop.xlane.xlu0 %668 }
 0x395   :  { %v462_v29 = vmax.f32 %v444_v50, 0.0  ;;  %v1536_v51 = vpop.f32.mrb[10].mxu1 }
 0x396   :  { %v459_v53 = vadd.f32 %v1536_v51, %v1241_v45  ;;  %v453_v54 = vpop.f32.mrb[11].mxu1 }
 0x397   :  { %v454_v55 = vadd.f32 %v1241_v45, %v453_v54  ;;  %1569 = vmatprep.mubr.f32.mxu0 %v462_v29  ;;  %v793_v45 = vpop.permute.xlu1 %792 }
 0x398   :  { %1570 = vmatmul.mubr.f32.vlgmr.msra.gmra.mrb[4].mxu0 %v463_v52  ;;  %v465_v57 = vmax.f32 %v459_v53, 0.0 }
 0x399   :  { %v464_v56 = vmax.f32 %v454_v55, 0.0  ;;  %1892 = vmatpush3.bf16.msra.mxu0 %v1891_v13  ;;  %v761_v55 = vpop.permute.xlu0 %760 }
 0x39a   :  { %1893 = vmatprep.subr.bf16.mxu0 %v2002_v12 }
 0x39b   :  { %1572 = vmatprep.mubr.f32.mxu0 %v464_v56  ;;  %v797_v47 = vpop.permute.xlu1 %796 }
 0x39c   :  { %1573 = vmatmul.mubr.f32.gmra.mrb[6].mxu0 %v465_v57 }
 0x39d   :  { %1895 = vmatpush3.bf16.msra.mxu0 %v1894_v22  ;;  %1667 = vmatprep.mubr.msk.f32.mxu0 %vm2003_vm2, %v2004_v30 }
 0x39e   :  { %1896 = vmatprep.subr.bf16.mxu0 %v2002_v12 }
 0x39f   :  { %v801_v29 = vpop.permute.xlu1 %800 }
 0x3a3   :  { %v805_v3 = vpop.permute.xlu1 %804 }
 0x46b   :  { %v1571_v14 = vpop.f32.mrb[4].mxu0 }
 0x46c   :  { %v549_v15 = vpop.f32.mrb[5].mxu0 }
 0x46d   :  { %v1852_v16 = vpack.c.bf16 %v1571_v14, %v549_v15 }
 0x46f   :  { %v1574_v17 = vpop.f32.mrb[6].mxu0  ;;  %1853 = vmatprep.subr.bf16.mxu1 %v1852_v16 }
 0x470   :  { %v559_v18 = vpop.f32.mrb[7].mxu0  ;;  %1855 = vmatpush3.bf16.msra.mxu1 %v1852_v16 }
 0x471   :  { %v1856_v19 = vpack.c.bf16 %v1574_v17, %v559_v18  ;;  %v1867_v18 = vpack.c.bf16 %v839_v11, %v838_v10 }
 0x473   :  { %1857 = vmatprep.subr.bf16.mxu1 %v1856_v19 }
 0x474   :  { %1859 = vmatpush3.bf16.msra.mxu1 %v1856_v19  ;;  %v840_v19 = vld [vmem:[%s2580_s7 + $0x10] sm:$0xff] }
 0x475   :  { %1860 = vmatprep.subr.bf16.mxu1 %v2002_v12 }
 0x477   :  { %1584 = vmatmul.mubr.msk.f32.vlgmr.msra.gmra.mrb[12].mxu1 %vm165_vm0, %v2166_v41  ;;  %v826_v41 = vld [vmem:[%s2579_s6 + $0x20] sm:$0xff] }
 0x478   :  { %1586 = vmatprep.mubr.msk.f32.mxu1 %vm165_vm0, %v2171_v42  ;;  %v827_v42 = vld [vmem:[%s2579_s6 + $0x28] sm:$0xff] }
 0x47b   :  { %1587 = vmatmul.mubr.msk.f32.gmra.mrb[14].mxu1 %vm165_vm0, %v2186_v46  ;;  %v1897_v46 = vpack.c.bf16 %v827_v42, %v826_v41 }
 0x47c   :  { %1597 = vmatprep.mubr.msk.f32.mxu1 %vm2003_vm2, %v2004_v30 }
 0x47d   :  { %1898 = vmatpush3.bf16.msra.mxu0 %v1897_v46  ;;  %v1870_v46 = vpack.c.bf16 %v841_v20, %v840_v19  ;;  %v1017_v20 = vld [vmem:[%s2582_s9 + $0x70] sm:$0xff] }
 0x47e   :  { %1899 = vmatprep.subr.bf16.mxu0 %v2002_v12 }
 0x481   :  { %1901 = vmatpush3.bf16.msra.mxu0 %v1900_v25 }
 0x482   :  { %1902 = vmatprep.subr.bf16.mxu0 %v2002_v12 }
 0x485   :  { %1904 = vmatpush3.bf16.msra.mxu0 %v1903_v28  ;;  %v1873_v28 = vpack.c.bf16 %v843_v24, %v842_v23  ;;  %v1100_v24 = vld [vmem:[%s2584_s11 + $0x18] sm:$0xff] }
 0x486   :  { %1905 = vmatprep.subr.bf16.mxu0 %v2002_v12 }
 0x489   :  { %1907 = vmatpush3.bf16.msra.mxu0 %v1906_v33 }
 0x48a   :  { %1908 = vmatprep.subr.bf16.mxu0 %v2002_v12 }
 0x48d   :  { %1910 = vmatpush3.bf16.msra.mxu0 %v1909_v36 }
 0x48e   :  { %1911 = vmatprep.subr.bf16.mxu0 %v2002_v12 }
 0x491   :  { %1913 = vmatpush3.bf16.msra.mxu0 %v1912_v39  ;;  %v847_v39 = vld [vmem:[%s2580_s7 + $0x48] sm:$0xff] }
 0x492   :  { %1938 = vmatprep.subr.bf16.mxu0 %v2002_v12 }
 0x54a   :  { %v1585_v50 = vpop.f32.mrb[12].mxu1 }
 0x54b   :  { %v648_v51 = vadd.f32 %v1585_v50, %v1263_v49  ;;  %v642_v52 = vpop.f32.mrb[13].mxu1 }
 0x54c   :  { %v643_v53 = vadd.f32 %v1263_v49, %v642_v52 }
 0x54d   :  { %v662_v54 = vmax.f32 %v648_v51, 0.0  ;;  %v851_v51 = vld [vmem:[%s2580_s7 + $0x68] sm:$0xff] }
 0x54e   :  { %v661_v56 = vmax.f32 %v643_v53, 0.0  ;;  %v1588_v57 = vpop.f32.mrb[14].mxu1  ;;  %v852_v53 = vld [vmem:[%s2580_s7 + $0x70] sm:$0xff] }
 0x54f   :  { %v808_v58 = vadd.f32 %v797_v47, %v662_v54  ;;  %v658_v60 = vadd.f32 %v1588_v57, %v1263_v49  ;;  %v779_v61 = vadd.f32 %v766_v40, %v662_v54  ;;  %v652_v62 = vpop.f32.mrb[15].mxu1  ;;  %v848_v47 = vld [vmem:[%s2580_s7 + $0x50] sm:$0xff]  ;;  %v1003_v57 = vld [vmem:[%s2582_s9] sm:$0xff] }
 0x550   :  { %v1861_v63 = vpack.c.bf16 %v662_v54, %v661_v56  ;;  %v807_v0 = vadd.f32 %v793_v45, %v661_v56  ;;  %v778_v1 = vadd.f32 %v761_v55, %v661_v56  ;;  %v653_v2 = vadd.f32 %v1263_v49, %v652_v62  ;;  %v849_v49 = vld [vmem:[%s2580_s7 + $0x58] sm:$0xff] }
 0x551   :  { %v664_v4 = vmax.f32 %v658_v60, 0.0  ;;  %v1879_v45 = vpack.c.bf16 %v847_v39, %v846_v38  ;;  %v1882_v50 = vpack.c.bf16 %v849_v49, %v848_v47  ;;  %v853_v54 = vld [vmem:[%s2580_s7 + $0x78] sm:$0xff]  ;;  %v670_v56 = vmax.f32 %v2370_v48, 1.0  ;;  %v1109_v39 = vld [vmem:[%s2584_s11 + $0x60] sm:$0xff] }
 0x552   :  { %v782_v5 = vmax.f32 %v778_v1, %v779_v61  ;;  %v663_v6 = vmax.f32 %v653_v2, 0.0  ;;  %v811_v7 = vmax.f32 %v807_v0, %v808_v58  ;;  %1862 = vmatpush3.bf16.msra.mxu1 %v1861_v63  ;;  %v1888_v55 = vpack.c.bf16 %v853_v54, %v852_v53  ;;  %v1004_v58 = vld [vmem:[%s2582_s9 + $0x8] sm:$0xff]  ;;  %v1005_v1 = vld [vmem:[%s2582_s9 + $0x10] sm:$0xff]  ;;  %v1006_v48 = vld [vmem:[%s2582_s9 + $0x18] sm:$0xff] }
 0x553   :  { %v781_v8 = vadd.f32 %v776_v44, %v664_v4  ;;  %v810_v9 = vadd.f32 %v805_v3, %v664_v4  ;;  %1863 = vmatprep.subr.bf16.mxu1 %v2002_v12  ;;  %1972 = vrcp.f32 %v670_v56  ;;  %v1915_v62 = vpack.c.bf16 %v1004_v58, %v1003_v57  ;;  %v1007_v3 = vld [vmem:[%s2582_s9 + $0x20] sm:$0xff] }
 0x554   :  { %v1864_v13 = vpack.c.bf16 %v664_v4, %v663_v6  ;;  %v780_v14 = vadd.f32 %v771_v43, %v663_v6  ;;  %v809_v15 = vadd.f32 %v801_v29, %v663_v6  ;;  %v850_v29 = vld [vmem:[%s2580_s7 + $0x60] sm:$0xff]  ;;  %v1918_v2 = vpack.c.bf16 %v1006_v48, %v1005_v1  ;;  %v1008_v4 = vld [vmem:[%s2582_s9 + $0x28] sm:$0xff]  ;;  %v1009_v6 = vld [vmem:[%s2582_s9 + $0x30] sm:$0xff] }
 0x555   :  { %v1885_v52 = vpack.c.bf16 %v851_v51, %v850_v29  ;;  %v1111_v51 = vld [vmem:[%s2584_s11 + $0x70] sm:$0xff] }
 0x556   :  { %v783_v16 = vmax.f32 %v780_v14, %v781_v8  ;;  %v812_v17 = vmax.f32 %v809_v15, %v810_v9  ;;  %1865 = vmatpush3.bf16.msra.mxu1 %v1864_v13  ;;  %v1011_v8 = vld [vmem:[%s2582_s9 + $0x40] sm:$0xff]  ;;  %v1012_v9 = vld [vmem:[%s2582_s9 + $0x48] sm:$0xff]  ;;  %v1013_v14 = vld [vmem:[%s2582_s9 + $0x50] sm:$0xff] }
 0x557   :  { %1866 = vmatprep.subr.bf16.mxu1 %v2002_v12  ;;  %v1927_v13 = vpack.c.bf16 %v1012_v9, %v1011_v8  ;;  %v1014_v15 = vld [vmem:[%s2582_s9 + $0x58] sm:$0xff] }
 0x558   :  { %v784_v21 = vmax.f32 %v782_v5, %v783_v16  ;;  %v813_v22 = vmax.f32 %v811_v7, %v812_v17  ;;  %v1921_v5 = vpack.c.bf16 %v1008_v4, %v1007_v3  ;;  %v1930_v16 = vpack.c.bf16 %v1014_v15, %v1013_v14  ;;  %v1015_v17 = vld [vmem:[%s2582_s9 + $0x60] sm:$0xff] }
 0x559   :  { %1598 = vmatmul.mubr.msk.f32.vlgmr.msra.gmra.mrb[16].mxu1 %vm165_vm0, %v2290_v59 }
 0x55a   :  { %v785_v41 = vrot.slane %v784_v21, 4  ;;  %v814_v42 = vrot.slane %v813_v22, 4  ;;  %1868 = vmatpush3.bf16.msra.mxu1 %v1867_v18  ;;  %1632 = vmatprep.mubr.msk.f32.mxu1 %vm2003_vm2, %v2004_v30  ;;  %v1016_v18 = vld [vmem:[%s2582_s9 + $0x68] sm:$0xff] }
 0x55b   :  { %1869 = vmatprep.subr.bf16.mxu1 %v2002_v12  ;;  %v1933_v19 = vpack.c.bf16 %v1016_v18, %v1015_v17 }
 0x55c   :  { %v786_v25 = vmax.f32 %v784_v21, %v785_v41  ;;  %v815_v26 = vmax.f32 %v813_v22, %v814_v42  ;;  %v1018_v21 = vld [vmem:[%s2582_s9 + $0x78] sm:$0xff]  ;;  %v1097_v41 = vld [vmem:[%s2584_s11] sm:$0xff]  ;;  %v1098_v42 = vld [vmem:[%s2584_s11 + $0x8] sm:$0xff] }
 0x55d   :  { %v1973_v60 = vpop.eup %1972  ;;  %v1936_v22 = vpack.c.bf16 %v1018_v21, %v1017_v20  ;;  %v1939_v23 = vpack.c.bf16 %v1098_v42, %v1097_v41 }
 0x55e   :  { %v787_v59 = vrot.slane %v786_v25, 2  ;;  %v816_v27 = vrot.slane %v815_v26, 2  ;;  %1871 = vmatpush3.bf16.msra.mxu1 %v1870_v46  ;;  %v1099_v46 = vld [vmem:[%s2584_s11 + $0x10] sm:$0xff] }
 0x55f   :  { %1872 = vmatprep.subr.bf16.mxu1 %v2002_v12 }
 0x560   :  { %v817_v33 = vmax.f32 %v815_v26, %v816_v27  ;;  %v788_v34 = vmax.f32 %v786_v25, %v787_v59  ;;  %v1942_v25 = vpack.c.bf16 %v1100_v24, %v1099_v46  ;;  %v1101_v26 = vld [vmem:[%s2584_s11 + $0x20] sm:$0xff]  ;;  %v1102_v59 = vld [vmem:[%s2584_s11 + $0x28] sm:$0xff] }
 0x561   :  { %v1945_v27 = vpack.c.bf16 %v1102_v59, %v1101_v26 }
 0x562   :  { %v818_v35 = vrot.slane %v817_v33, 1  ;;  %v789_v36 = vrot.slane %v788_v34, 1  ;;  %1874 = vmatpush3.bf16.msra.mxu1 %v1873_v28  ;;  %v1103_v28 = vld [vmem:[%s2584_s11 + $0x30] sm:$0xff] }
 0x563   :  { %1875 = vmatprep.subr.bf16.mxu1 %v2002_v12  ;;  %v1948_v32 = vpack.c.bf16 %v1104_v31, %v1103_v28 }
 0x564   :  { %v790_v40 = vmax.f32 %v788_v34, %v789_v36  ;;  %v819_v43 = vmax.f32 %v817_v33, %v818_v35  ;;  %v1105_v33 = vld [vmem:[%s2584_s11 + $0x40] sm:$0xff]  ;;  %v1106_v34 = vld [vmem:[%s2584_s11 + $0x48] sm:$0xff]  ;;  %v1107_v36 = vld [vmem:[%s2584_s11 + $0x50] sm:$0xff] }
 0x565   :  { %v1951_v35 = vpack.c.bf16 %v1106_v34, %v1105_v33 }
 0x566   :  { %v821_v44 = vsel %vm820_vm3, %v790_v40, %v819_v43  ;;  %1877 = vmatpush3.bf16.msra.mxu1 %v1876_v37  ;;  %v1108_v37 = vld [vmem:[%s2584_s11 + $0x58] sm:$0xff]  ;;  %v1110_v40 = vld [vmem:[%s2584_s11 + $0x68] sm:$0xff] }
 0x567   :  { %1668 = vmatmul.mubr.f32.vlgmr.msra.gmra.mrb[8].mxu0 %v821_v44  ;;  %1878 = vmatprep.subr.bf16.mxu1 %v2002_v12  ;;  %v1954_v38 = vpack.c.bf16 %v1108_v37, %v1107_v36  ;;  %v1957_v43 = vpack.c.bf16 %v1110_v40, %v1109_v39 }
 0x568   :  { %1737 = vmatprep.mubr.msk.f32.mxu0 %vm2003_vm2, %v2004_v30  ;;  %1940 = vmatpush3.bf16.msra.mxu0 %v1939_v23 }
 0x569   :  { %1941 = vmatprep.subr.bf16.mxu0 %v2002_v12 }
 0x56a   :  { %1880 = vmatpush3.bf16.msra.mxu1 %v1879_v45  ;;  %v1273_v45 = vld [vmem:[%s2581_s8] ss:$0 sm:$0xff]  ;;  %s2005_s8 = smov [#allocation3]  }
 0x56b   :  { %1881 = vmatprep.subr.bf16.mxu1 %v2002_v12 }
 0x56c   :  { %1943 = vmatpush3.bf16.msra.mxu0 %v1942_v25 }
 0x56d   :  { %1944 = vmatprep.subr.bf16.mxu0 %v2002_v12 }
 0x56e   :  { %1883 = vmatpush3.bf16.msra.mxu1 %v1882_v50 }
 0x56f   :  { %1884 = vmatprep.subr.bf16.mxu1 %v2002_v12 }
 0x570   :  { %1946 = vmatpush3.bf16.msra.mxu0 %v1945_v27 }
 0x571   :  { %1947 = vmatprep.subr.bf16.mxu0 %v2002_v12 }
 0x572   :  { %1886 = vmatpush3.bf16.msra.mxu1 %v1885_v52  ;;  %v1112_v52 = vld [vmem:[%s2584_s11 + $0x78] sm:$0xff]  ;;  %s1209_s11 = sshll.u32 %s2005_s8, 4  ;;  %s1210_s11 = int_to_ptr.vmem [resolvable:$true] %s1209_s11 }
 0x573   :  { %1887 = vmatprep.subr.bf16.mxu1 %v2002_v12  ;;  %v1960_v53 = vpack.c.bf16 %v1112_v52, %v1111_v51  ;;  %s1976_s21 = scalar_lea.vmem %s1210_s11, 32  ;;  %p1981_p1 = scmp.lt.s32.totalorder %s1210_s11, %s1210_s11 }
 0x574   :  { %1949 = vmatpush3.bf16.msra.mxu0 %v1948_v32  ;;  %p1977_p0 = scmp.ne.s32.totalorder %s1210_s11, %s1976_s21  ;;  %p1982_p2 = scmp.lt.s32.totalorder %s1976_s21, %s1976_s21 }
 0x575   :  { %1950 = vmatprep.subr.bf16.mxu0 %v2002_v12 }
 0x576   :  { %1889 = vmatpush3.bf16.msra.mxu1 %v1888_v55  ;;  %p1983_p3 = por %p1982_p2, %p1981_p1 }
 0x577   :  { %1914 = vmatprep.subr.bf16.mxu1 %v2002_v12 }
 0x578   :  { %1952 = vmatpush3.bf16.msra.mxu0 %v1951_v35  ;;  %p1984_p4 = pnand %p1983_p3, %p1977_p0 }
 0x579   :  { %1953 = vmatprep.subr.bf16.mxu0 %v2002_v12 }
 0x57c   :  { %1955 = vmatpush3.bf16.msra.mxu0 %v1954_v38 }
 0x57d   :  { %1956 = vmatprep.subr.bf16.mxu0 %v2002_v12 }
 0x580   :  { %1958 = vmatpush3.bf16.msra.mxu0 %v1957_v43 }
 0x581   :  { %1959 = vmatprep.subr.bf16.mxu0 %v2002_v12 }
 0x584   :  { %1961 = vmatpush3.bf16.msra.mxu0 %v1960_v53 }
 0x62c   :  { %v741_v61 = vpop.f32.mrb[16].mxu1 }
 0x62d   :  { %v745_v63 = vmul.f32 %v1973_v60, %v741_v61  ;;  %v1599_v0 = vpop.f32.mrb[17].mxu1 }
 0x62f   :  { %1633 = vmatmul.mubr.f32.vlgmr.msra.gmra.mrb[18].mxu1 %v745_v63 }
 0x630   :  { %1916 = vmatpush3.bf16.msra.mxu1 %v1915_v62  ;;  %1702 = vmatprep.mubr.msk.f32.mxu1 %vm2003_vm2, %v2004_v30  ;;  %v1010_v30 = vld [vmem:[%s2582_s9 + $0x38] sm:$0xff] }
 0x631   :  { %1917 = vmatprep.subr.bf16.mxu1 %v2002_v12  ;;  %v1924_v7 = vpack.c.bf16 %v1010_v30, %v1009_v6 }
 0x634   :  { %1919 = vmatpush3.bf16.msra.mxu1 %v1918_v2 }
 0x635   :  { %1920 = vmatprep.subr.bf16.mxu1 %v2002_v12 }
 0x638   :  { %1922 = vmatpush3.bf16.msra.mxu1 %v1921_v5 }
 0x639   :  { %1923 = vmatprep.subr.bf16.mxu1 %v2002_v12 }
 0x63a   :  { %v990_v10 = vpop.f32.mrb[8].mxu0 }
 0x63b   :  { %v1669_v11 = vpop.f32.mrb[9].mxu0 }
 0x63c   :  { %1925 = vmatpush3.bf16.msra.mxu1 %v1924_v7 }
 0x63d   :  { %1926 = vmatprep.subr.bf16.mxu1 %v2002_v12 }
 0x640   :  { %1928 = vmatpush3.bf16.msra.mxu1 %v1927_v13 }
 0x641   :  { %1929 = vmatprep.subr.bf16.mxu1 %v2002_v12 }
 0x644   :  { %1931 = vmatpush3.bf16.msra.mxu1 %v1930_v16 }
 0x645   :  { %1932 = vmatprep.subr.bf16.mxu1 %v2002_v12 }
 0x648   :  { %1934 = vmatpush3.bf16.msra.mxu1 %v1933_v19 }
 0x649   :  { %1935 = vmatprep.subr.bf16.mxu1 %v2002_v12  ;;  %v1274_v12 = vld [vmem:[%s2583_s10] ss:$0 sm:$0xff] }
 0x64c   :  { %1937 = vmatpush3.bf16.msra.mxu1 %v1936_v22 }
 0x702   :  { %v920_v44 = vpop.f32.mrb[18].mxu1 }
 0x703   :  { %v991_v47 = vadd.f32 %v990_v10, %v920_v44  ;;  %v1634_v49 = vpop.f32.mrb[19].mxu1 }
 0x705   :  { %v1001_v50 = vadd.f32 %v1273_v45, %v991_v47 }
 0x707   :  { %v1002_v29 = vmax.f32 %v1001_v50, 0.0 }
 0x709   :  { %1703 = vmatmul.mubr.f32.vlgmr.msra.gmra.mrb[20].mxu1 %v1002_v29 }
 0x7dc   :  { %v1092_v54 = vpop.f32.mrb[20].mxu1 }
 0x7dd   :  { %v1093_v55 = vadd.f32 %v1274_v12, %v1092_v54  ;;  %v1704_v56 = vpop.f32.mrb[21].mxu1 }
 0x7df   :  { %v1096_v57 = vmax.f32 %v1093_v55, 0.0  ;;  %v1192_v58 = vmul.f32 %v1093_v55, %v1093_v55 }
 0x7e1   :  { %1738 = vmatmul.mubr.f32.vlgmr.msra.gmra.mrb[10].mxu0 %v1096_v57  ;;  %v1194_v60 = vsel %vm1193_vm4, %v1192_v58, 0.0 }
 0x7e2   :  { %1195 = vadd.xlane.f32.xlu1 %v1194_v60 }
 0x86f   :  { %v1196_v61 = vpop.xlane.xlu1 %1195 }
 0x870   :  { %v1197_v62 = vmax.f32 %v1196_v61, 1e-24 }
 0x872   :  { %1974 = vrsqrt.f32 %v1197_v62 }
 0x87c   :  { %v1975_v63 = vpop.eup %1974 }
 0x87d   :  { %v1199_v0 = vmul.f32 %v1975_v63, %v1093_v55 }
 0x87f   :  { %1200 = vst [vmem:[#allocation3] sm:$0x3] %v1199_v0 }
 0x880   :  { %1987 = shalt.err (!%p1984_p4)
}
 0x881   :  { %s1988_s6 = scalar_lea.hbm %s2587_s14, 32 }
 0x882   :  { %p1989_p5 = scmp.ne.s32.totalorder %s2587_s14, %s1988_s6  ;;  %p1992_p6 = scmp.lt.u32.totalorder %s1988_s6, %s2587_s14 }
 0x884   :  { %p1994_p7 = pnand %p1992_p6, %p1989_p5 }
 0x886   :  { %1997 = shalt.err (!%p1994_p7)
}
 0x887   :  { %1212 = dma.vmem_to_hbm [thread:$0]  %s1210_s11, 32, %s2587_s14, [#allocation4]   ;;  %v1275_v1 = vld [vmem:[#allocation2] ss:$0 sm:$0xff]  ;;  %vm1190_vm5 = vcmask 1024  }
 0x8b4   :  { %v1186_v48 = vpop.f32.mrb[10].mxu0 }
 0x8b5   :  { %v1187_v2 = vadd.f32 %v1275_v1, %v1186_v48  ;;  %v1739_v3 = vpop.f32.mrb[11].mxu0 }
 0x8b7   :  { %1191 = vst.msk [vmem:[%s2586_s13] sm:$0x3] %vm1190_vm5, %v1187_v2 }
 0x8b8   :  { %1998 = dma.done.wait [#allocation4], 32  }
 0x8b9   :  { %1999 = vsyncadd [#allocation4], 4294967264 }
 0x8ba   :  { %1218 = vsyncpa [#allocation4], 1 }

</bundles_post_ra>
